<compile_context>
chip_gen: v7x
topology: tpu7x:2x2x1
jax: 0.10.0
libtpu: 0.0.40
codegen_flags: <defaults>
</compile_context>

<pallas_src>
import jax
import jax.numpy as jnp
from jax.experimental import pallas as pl
from jax.experimental.pallas import tpu as pltpu


def _round_up(x, m):
    return ((x + m - 1) // m) * m


def _head_kernel(x_ref, w1_ref, b1_ref, w2_ref, b2_ref, batch_ref, out_ref):
    # grid = (core split [parallel], atom tiles [arbitrary, reduction axis last])
    i = pl.program_id(1)

    @pl.when(i == 0)
    def _init():
        out_ref[...] = jnp.zeros_like(out_ref)

    # ---- MLP: Linear(D,D) -> SiLU -> Linear(D,1) ----
    # First Linear on the MXU: bf16 operands (x pre-cast in the wrapper), f32 accumulate.
    h = jnp.dot(x_ref[...], w1_ref[...], preferred_element_type=jnp.float32) + b1_ref[...]
    h = h * jax.nn.sigmoid(h)                                             # SiLU (EUP + VPU)
    # Second Linear (D -> 1): VPU multiply + lane reduce (no degenerate 1-lane matmul).
    y = jnp.sum(h * w2_ref[...], axis=-1, keepdims=True) + b2_ref[...]    # [TA, 1] f32

    # ---- scatter(reduce="sum") atoms -> molecules, lane-dense accumulator ----
    tm = out_ref.shape[-1]
    mol_ids = jax.lax.broadcasted_iota(jnp.int32, (1, tm), 1)             # lane-only iota
    # padded atoms carry molecule id -1 -> never match -> contribute exactly 0
    contrib = jnp.where(batch_ref[...] == mol_ids, y, 0.0)                # [TA, TM] f32
    out_ref[...] += jnp.sum(contrib, axis=0, keepdims=True)[None]         # [1, 1, TM]


def graph_binary_classification_head(x, batch, n_molecules, params, *,
                                     tile_a=2048, num_cores=2):
    """Forward pass of GraphBinaryClassificationOutputHead (reduction='sum').

    x:      [n_atoms, D]  backbone_output['energy']
    batch:  [n_atoms]     int, atom -> molecule id (data.batch)
    params: (w1 [D, D], b1 [D], w2 [D], b2 scalar)
    returns [n_molecules] float32
    """
    w1, b1, w2, b2 = params
    n_atoms, d = x.shape
    f32, bf16 = jnp.float32, jnp.bfloat16

    num_cores = max(int(num_cores), 1)
    tile_a = _round_up(max(int(tile_a), 16), 16)   # bf16 sublane packing -> multiple of 16
    # don't over-pad tiny inputs: clamp the atom tile to what is actually needed per core
    per_core = (max(n_atoms, 1) + num_cores - 1) // num_cores
    tile_a = min(tile_a, _round_up(per_core, 16))

    d_pad = _round_up(d, 128)
    m_pad = _round_up(max(int(n_molecules), 1), 128)    # single lane-dense molecule block
    n_pad = _round_up(max(n_atoms, 1), num_cores * tile_a)
    tiles_per_core = n_pad // (num_cores * tile_a)

    # x in bf16; the cast is fused into the single pad pass (zero rows/cols contribute 0).
    if (n_atoms, d) == (n_pad, d_pad):
        x_p = x.astype(bf16)
    else:
        x_p = jnp.zeros((n_pad, d_pad), bf16).at[:n_atoms, :d].set(x.astype(bf16))

    w1_p = jnp.zeros((d_pad, d_pad), bf16).at[:d, :d].set(w1.astype(bf16))
    b1_p = jnp.zeros((1, d_pad), f32).at[0, :d].set(jnp.asarray(b1, f32).reshape(d))
    w2_p = jnp.zeros((1, d_pad), f32).at[0, :d].set(jnp.asarray(w2, f32).reshape(d))
    b2_p = jnp.full((1, 1), b2, f32)

    # padded atoms get molecule id -1 -> dropped by the scatter's compare
    if n_atoms == n_pad:
        batch_p = batch.astype(jnp.int32).reshape(n_pad, 1)
    else:
        batch_p = jnp.full((n_pad, 1), -1, jnp.int32).at[:n_atoms, 0].set(
            batch.astype(jnp.int32))

    grid = (num_cores, tiles_per_core)

    out = pl.pallas_call(
        _head_kernel,
        out_shape=jax.ShapeDtypeStruct((num_cores, 1, m_pad), f32),
        grid_spec=pltpu.PrefetchScalarGridSpec(
            num_scalar_prefetch=0,
            grid=grid,
            in_specs=[
                pl.BlockSpec((tile_a, d_pad),
                             lambda c, i: (c * tiles_per_core + i, 0)),   # x (bf16)
                pl.BlockSpec((d_pad, d_pad), lambda c, i: (0, 0)),        # W1 (bf16, pinned)
                pl.BlockSpec((1, d_pad), lambda c, i: (0, 0)),            # b1
                pl.BlockSpec((1, d_pad), lambda c, i: (0, 0)),            # w2 row
                pl.BlockSpec((1, 1), lambda c, i: (0, 0)),                # b2
                pl.BlockSpec((tile_a, 1),
                             lambda c, i: (c * tiles_per_core + i, 0)),   # batch ids
            ],
            out_specs=pl.BlockSpec((1, 1, m_pad), lambda c, i: (c, 0, 0)),
        ),
        compiler_params=pltpu.CompilerParams(
            dimension_semantics=("parallel", "arbitrary"),
            vmem_limit_bytes=32 * 1024 * 1024,
        ),
    )(x_p, w1_p, b1_p, w2_p, b2_p, batch_p)

    # sum the (tiny) per-core partial rows; slice + squeeze == rearrange 'b 1 -> b'
    return out.sum(axis=0)[0, :n_molecules]


if __name__ == "__main__":
    key = jax.random.PRNGKey(0)
    n_atoms, d, n_mol = 80, 32, 5          # 80 atoms, emb_size_atom=32, 5 graphs
    k1, k2, k3, k4 = jax.random.split(key, 4)

    x = jax.random.normal(k1, (n_atoms, d), jnp.float32)           # backbone_output['energy']
    w1 = jax.random.normal(k2, (d, d), jnp.float32) / jnp.sqrt(d)
    b1 = jax.random.normal(k3, (d,), jnp.float32) * 0.01
    w2 = jax.random.normal(k4, (d,), jnp.float32) / jnp.sqrt(d)
    b2 = jnp.float32(0.1)
    # uneven molecule sizes; molecule 2 straddles the two-core atom split
    counts = jnp.array([10, 23, 19, 15, 13], dtype=jnp.int32)
    batch = jnp.repeat(jnp.arange(n_mol, dtype=jnp.int32), counts)        # data.batch

    # tile_a=16 -> 3 atom-tile steps per core, exercising the accumulating output path
    out = graph_binary_classification_head(x, batch, n_mol, (w1, b1, w2, b2),
                                           tile_a=16, num_cores=2)
    out = jax.block_until_ready(out)

    # pure-JAX reference mirroring the kernel's bf16 MXU operands (f32 accumulate)
    h_ref = jnp.dot(x.astype(jnp.bfloat16), w1.astype(jnp.bfloat16),
                    preferred_element_type=jnp.float32) + b1
    h_ref = h_ref * jax.nn.sigmoid(h_ref)
    y_ref = jnp.sum(h_ref * w2[None, :], axis=-1) + b2
    ref = jnp.zeros(n_mol, jnp.float32).at[batch].add(y_ref)

    assert out.shape == (n_mol,)
    assert jnp.allclose(out, ref, atol=1e-3, rtol=1e-3), (out, ref)
    print("KERNEL_OK")
</pallas_src>

<mosaic_0001>
module attributes {stable_mosaic.version = 11 : i64} {
  func.func @_head_kernel(%arg0: i32, %arg1: i32, %arg2: memref<16x128xbf16, #tpu.memory_space<vmem>>, %arg3: memref<128x128xbf16, #tpu.memory_space<vmem>>, %arg4: memref<1x128xf32, #tpu.memory_space<vmem>>, %arg5: memref<1x128xf32, #tpu.memory_space<vmem>>, %arg6: memref<1x1xf32, #tpu.memory_space<vmem>>, %arg7: memref<16x1xi32, #tpu.memory_space<vmem>>, %arg8: memref<1x1x128xf32, #tpu.memory_space<vmem>>) attributes {dimension_semantics = [#tpu.dimension_semantics<parallel>, #tpu.dimension_semantics<arbitrary>], iteration_bounds = array<i64: 2, 3>, scalar_prefetch = 0 : i64, scratch_operands = 0 : i64, tpu.core_type = #tpu.core_type<tc>, window_params = [{transform_indices = @transform_0, window_bounds = array<i64: 16, 128>}, {pipeline_mode = #tpu.pipeline_mode<synchronous>, transform_indices = @transform_1, window_bounds = array<i64: 128, 128>}, {pipeline_mode = #tpu.pipeline_mode<synchronous>, transform_indices = @transform_2, window_bounds = array<i64: 1, 128>}, {pipeline_mode = #tpu.pipeline_mode<synchronous>, transform_indices = @transform_3, window_bounds = array<i64: 1, 128>}, {pipeline_mode = #tpu.pipeline_mode<synchronous>, transform_indices = @transform_4, window_bounds = array<i64: 1, 1>}, {transform_indices = @transform_5, window_bounds = array<i64: 16, 1>}, {transform_indices = @transform_6, window_bounds = array<i64: 1, 1, 128>}]} {
    %c0_i32 = arith.constant 0 : i32
    %0 = arith.cmpi eq, %arg1, %c0_i32 : i32
    %1 = arith.extui %0 : i1 to i32
    %c0_i32_0 = arith.constant 0 : i32
    %2 = arith.cmpi ne, %1, %c0_i32_0 : i32
    scf.if %2 {
      %cst_22 = arith.constant 0.000000e+00 : f32
      %38 = vector.broadcast %cst_22 : f32 to vector<1x1x128xf32>
      %c0_23 = arith.constant 0 : index
      %c0_24 = arith.constant 0 : index
      %c0_25 = arith.constant 0 : index
      %39 = vector.load %arg8[%c0_23, %c0_24, %c0_25] : memref<1x1x128xf32, #tpu.memory_space<vmem>>, vector<1x1x128xf32>
      tpu.vector_store %arg8[%c0_23, %c0_24, %c0_25], %38 {strides = array<i32>} : memref<1x1x128xf32, #tpu.memory_space<vmem>>, vector<1x1x128xf32>,
    } else {
    }
    %c0 = arith.constant 0 : index
    %c0_1 = arith.constant 0 : index
    %3 = vector.load %arg2[%c0, %c0_1] : memref<16x128xbf16, #tpu.memory_space<vmem>>, vector<16x128xbf16>
    %c0_2 = arith.constant 0 : index
    %c0_3 = arith.constant 0 : index
    %4 = vector.load %arg3[%c0_2, %c0_3] : memref<128x128xbf16, #tpu.memory_space<vmem>>, vector<128x128xbf16>
    %cst = arith.constant dense<0.000000e+00> : vector<16x128xf32>
    %5 = tpu.matmul %3, %4, %cst {dimension_numbers = #tpu.dot_dimension_numbers<[1], [0], [0], [1], [0, 0, 1, 1], [], []>} : vector<16x128xbf16>, vector<128x128xbf16>, vector<16x128xf32> -> vector<16x128xf32>
    %c0_4 = arith.constant 0 : index
    %c0_5 = arith.constant 0 : index
    %6 = vector.load %arg4[%c0_4, %c0_5] : memref<1x128xf32, #tpu.memory_space<vmem>>, vector<1x128xf32>
    %7 = vector.broadcast %6 : vector<1x128xf32> to vector<16x128xf32>
    %8 = arith.addf %5, %7 : vector<16x128xf32>
    %9 = arith.negf %8 : vector<16x128xf32>
    %10 = math.exp %9 : vector<16x128xf32>
    %cst_6 = arith.constant 1.000000e+00 : f32
    %11 = vector.broadcast %cst_6 : f32 to vector<16x128xf32>
    %12 = arith.addf %11, %10 : vector<16x128xf32>
    %13 = arith.divf %11, %12 : vector<16x128xf32>
    %14 = arith.mulf %8, %13 : vector<16x128xf32>
    %c0_7 = arith.constant 0 : index
    %c0_8 = arith.constant 0 : index
    %15 = vector.load %arg5[%c0_7, %c0_8] : memref<1x128xf32, #tpu.memory_space<vmem>>, vector<1x128xf32>
    %16 = vector.broadcast %15 : vector<1x128xf32> to vector<16x128xf32>
    %17 = arith.mulf %14, %16 : vector<16x128xf32>
    %cst_9 = arith.constant dense<0.000000e+00> : vector<16xf32>
    %18 = vector.multi_reduction <add>, %17, %cst_9 [1] : vector<16x128xf32> to vector<16xf32>
    %19 = vector.shape_cast %18 : vector<16xf32> to vector<16x1xf32>
    %c0_10 = arith.constant 0 : index
    %c0_11 = arith.constant 0 : index
    %20 = vector.load %arg6[%c0_10, %c0_11] : memref<1x1xf32, #tpu.memory_space<vmem>>, vector<1x1xf32>
    %21 = vector.broadcast %20 : vector<1x1xf32> to vector<16x1xf32>
    %22 = arith.addf %19, %21 : vector<16x1xf32>
    %23 = tpu.iota {dimensions = array<i32: 1>} : vector<1x128xi32>
    %c0_12 = arith.constant 0 : index
    %c0_13 = arith.constant 0 : index
    %24 = vector.load %arg7[%c0_12, %c0_13] : memref<16x1xi32, #tpu.memory_space<vmem>>, vector<16x1xi32>
    %25 = vector.broadcast %24 : vector<16x1xi32> to vector<16x128xi32>
    %26 = vector.broadcast %23 : vector<1x128xi32> to vector<16x128xi32>
    %27 = arith.cmpi eq, %25, %26 : vector<16x128xi32>
    %cst_14 = arith.constant 0.000000e+00 : f32
    %28 = vector.shape_cast %22 : vector<16x1xf32> to vector<16x1xf32>
    %29 = vector.broadcast %28 : vector<16x1xf32> to vector<16x128xf32>
    %30 = vector.broadcast %cst_14 : f32 to vector<16x128xf32>
    %31 = arith.select %27, %29, %30 : vector<16x128xi1>, vector<16x128xf32>
    %c0_15 = arith.constant 0 : index
    %c0_16 = arith.constant 0 : index
    %c0_17 = arith.constant 0 : index
    %32 = vector.load %arg8[%c0_15, %c0_16, %c0_17] : memref<1x1x128xf32, #tpu.memory_space<vmem>>, vector<1x1x128xf32>
    %cst_18 = arith.constant dense<0.000000e+00> : vector<128xf32>
    %33 = vector.multi_reduction <add>, %31, %cst_18 [0] : vector<16x128xf32> to vector<128xf32>
    %34 = vector.shape_cast %33 : vector<128xf32> to vector<1x128xf32>
    %35 = vector.shape_cast %34 : vector<1x128xf32> to vector<1x1x128xf32>
    %36 = arith.addf %32, %35 : vector<1x1x128xf32>
    %c0_19 = arith.constant 0 : index
    %c0_20 = arith.constant 0 : index
    %c0_21 = arith.constant 0 : index
    %37 = vector.load %arg8[%c0_19, %c0_20, %c0_21] : memref<1x1x128xf32, #tpu.memory_space<vmem>>, vector<1x1x128xf32>
    tpu.vector_store %arg8[%c0_19, %c0_20, %c0_21], %36 {strides = array<i32>} : memref<1x1x128xf32, #tpu.memory_space<vmem>>, vector<1x1x128xf32>,
    return
  }
  func.func @transform_0(%arg0: i32, %arg1: i32) -> (i32, i32) {
    %c3_i32 = arith.constant 3 : i32
    %0 = arith.muli %arg0, %c3_i32 : i32
    %1 = arith.addi %0, %arg1 : i32
    %c0_i32 = arith.constant 0 : i32
    %c0_i32_0 = arith.constant 0 : i32
    return %1, %c0_i32 : i32, i32
  }
  func.func @transform_1(%arg0: i32, %arg1: i32) -> (i32, i32) {
    %c0_i32 = arith.constant 0 : i32
    %c0_i32_0 = arith.constant 0 : i32
    %c0_i32_1 = arith.constant 0 : i32
    return %c0_i32, %c0_i32_0 : i32, i32
  }
  func.func @transform_2(%arg0: i32, %arg1: i32) -> (i32, i32) {
    %c0_i32 = arith.constant 0 : i32
    %c0_i32_0 = arith.constant 0 : i32
    %c0_i32_1 = arith.constant 0 : i32
    return %c0_i32, %c0_i32_0 : i32, i32
  }
  func.func @transform_3(%arg0: i32, %arg1: i32) -> (i32, i32) {
    %c0_i32 = arith.constant 0 : i32
    %c0_i32_0 = arith.constant 0 : i32
    %c0_i32_1 = arith.constant 0 : i32
    return %c0_i32, %c0_i32_0 : i32, i32
  }
  func.func @transform_4(%arg0: i32, %arg1: i32) -> (i32, i32) {
    %c0_i32 = arith.constant 0 : i32
    %c0_i32_0 = arith.constant 0 : i32
    %c0_i32_1 = arith.constant 0 : i32
    return %c0_i32, %c0_i32_0 : i32, i32
  }
  func.func @transform_5(%arg0: i32, %arg1: i32) -> (i32, i32) {
    %c3_i32 = arith.constant 3 : i32
    %0 = arith.muli %arg0, %c3_i32 : i32
    %1 = arith.addi %0, %arg1 : i32
    %c0_i32 = arith.constant 0 : i32
    %c0_i32_0 = arith.constant 0 : i32
    return %1, %c0_i32 : i32, i32
  }
  func.func @transform_6(%arg0: i32, %arg1: i32) -> (i32, i32, i32) {
    %c0_i32 = arith.constant 0 : i32
    %c0_i32_0 = arith.constant 0 : i32
    %c0_i32_1 = arith.constant 0 : i32
    return %arg0, %c0_i32, %c0_i32_0 : i32, i32, i32
  }
}

</mosaic_0001>

<bundles_post_ra>
// kernel: tpu_custom_call.1
= control target key start
LH: loop header
LB: loop body
LE: loop exit
PB: predicated region body
PF: predicated region fallthrough
CT: control target
= control target key end

     0   :  { %s1288_s0 = inlined_call_operand.hbm [shape: bf16[96,128], index: 0, kind: input, shape index: {}]   ;;  %s1289_s1 = inlined_call_operand.vmem [shape: bf16[128,128], index: 1, kind: input, shape index: {}]   ;;  %s1290_s2 = inlined_call_operand.vmem [shape: f32[1,128], index: 2, kind: input, shape index: {}]   ;;  %s1291_s3 = inlined_call_operand.vmem [shape: f32[1,128], index: 3, kind: input, shape index: {}]   ;;  %s1292_s4 = inlined_call_operand.<no memory space> [shape: f32[1,1], index: 4, kind: input, shape index: {}]   ;;  %s1293_s5 = inlined_call_operand.vmem [shape: s32[96,1], index: 5, kind: input, shape index: {}]   ;;  %s1294_s6 = inlined_call_operand.hbm [shape: f32[2,1,128], index: 6, kind: output, shape index: {}]  }
   0x1   :  { %v11_v0 = vstv %s1292_s4 }
   0x2   :  { %12 = vst [vmem:[#allocation2] sm:$0x1] %v11_v0 }
   0x3   :  { %13 = vsyncpa [#allocation4], 0 }
   0x4   :  { %15 = vsyncpa [#allocation4 + $0x1], 0 }
   0x5   :  { %16 = vsyncpa [#allocation5], 0 }
   0x6   :  { %18 = vsyncpa [#allocation5 + $0x1], 0  ;;  %s1014_s23 = smov 0   ;;  %s1016_s24 = smov 0  }
   0x7   :  { %s1018_s25 = smov 0   ;;  %s1020_s26 = smov 0  }
   0x8   :  { %s1022_s27 = smov 0   ;;  %s1024_s28 = smov 0  }
   0x9   :  { %s1026_s29 = smov 0   ;;  %s1028_s4 = smov 0  }
   0xa   :  { %s1030_s30 = smov 0   ;;  %s1032_s7 = smov 0  }
   0xb   :  { %s1034_s8 = smov 0  }
   0xc LB: > { %1299 = sst [smem:[#allocation9_spill]] %s958_s30  ;;  %s628_s9 = sadd.s32 4294967295, %s966_s8   ;;  %s966_s8 = sphi %s1034_s8, %s24_s8   ;;  %s962_s7 = sphi %s1032_s7, %s1321_s7   ;;  %s958_s30 = sphi %s1030_s30, %s1312_s30   ;;  %s954_s4 = sphi %s1028_s4, %s1320_s4   ;;  %s950_s29 = sphi %s1026_s29, %s1311_s29   ;;  %s946_s28 = sphi %s1024_s28, %s1319_s28   ;;  %s942_s27 = sphi %s1022_s27, %s1318_s27   ;;  %s938_s26 = sphi %s1020_s26, %s1317_s26   ;;  %s934_s25 = sphi %s1018_s25, %s1316_s25   ;;  %s930_s24 = sphi %s1016_s24, %s1315_s24   ;;  %s926_s23 = sphi %s1014_s23, %s1314_s23  }
   0xd   : > { %s33_s11 = sadd.s32 1, %s958_s30  ;;  %s36_s12 = sadd.s32 1, %s962_s7 }
   0xe   : > { %p34_p0 = scmp.ge.s32.totalorder %s33_s11, 3  ;;  %s40_s13 = smul.u32 3, %s962_s7 }
   0xf   : > { %s47_s14 = sadd.s32 1, %s946_s28  ;;  %p54_p1 = scmp.ne.s32.totalorder %s946_s28, %s942_s27 }
  0x10   : > { %s1323_s11 = smov (%p34_p0, %s33_s11), 0  ;;  %s1325_s12 = smov (!%p34_p0, %s36_s12), %s962_s7 }
  0x11   : > { %1300 = sst [smem:[#allocation10_spill]] %s1323_s11  ;;  %s41_s15 = sadd.s32 %s958_s30, %s40_s13 }
  0x12   : > { %p55_p2 = scmp.eq.s32.totalorder %s966_s8, 0  ;;  %p38_p3 = scmp.ge.s32.totalorder %s1325_s12, 2 }
  0x13   : > { %p60_p4 = scmp.ne.s32.totalorder %s942_s27, %s938_s26  ;;  %p61_p6 = scmp.eq.s32.totalorder %s628_s9, 0 }
  0x14   : > { %p1081_p5 = por %p55_p2, %p54_p1  ;;  %s1327_s12 = smov (%p38_p3, %s1325_s12), 0 }
  0x15   : > { %1302 = sst [smem:[#allocation11_spill]] %s1327_s12  ;;  %p1087_p7 = por %p61_p6, %p60_p4 }
  0x16   : > { %s187_s18 = sadd.s32 1, %s934_s25  ;;  %s42_s19 = smul.u32 3, %s1327_s12 }
  0x17   : > { %s184_s20 = ssub.s32 %s962_s7, %s1327_s12  ;;  %p197_p9 = scmp.ne.s32.totalorder %s934_s25, %s930_s24 }
  0x18   : > { %p185_p8 = scmp.eq.s32.totalorder %s184_s20, 0  ;;  %s43_s21 = sadd.s32 %s42_s19, %s1323_s11 }
  0x19   : > { %p198_p10 = scmp.eq.s32.totalorder %s628_s9, 5  ;;  %s44_s22 = ssub.s32 %s41_s15, %s43_s21 }
  0x1a   : > { %p203_p11 = scmp.ne.s32.totalorder %s930_s24, %s926_s23  ;;  %p45_p12 = scmp.eq.s32.totalorder %s44_s22, 0 }
  0x1b   : > { %p1100_p13 = por %p198_p10, %p197_p9  ;;  %s1305_s30 = sadd.s32 4294967294, %s966_s8  }
  0x1c   : > { %s1105_s13 = scalar_select %p185_p8, %s934_s25, %s187_s18  }
  0x1d   : > { %s1304_s26 = scalar_select %p1100_p13, 1, 0 }
  0x1e   : > { %s1108_s10 = scalar_select %p45_p12, %s946_s28, %s47_s14  }
  0x1f   : > { %p204_p0 = scmp.eq.s32.totalorder %s1305_s30, 5  ;;  %p699_p1 = scmp.lt.s32.totalorder %s966_s8, 6 }
  0x20   : > { %s236_s12 = sand.u32 1, %s946_s28   ;;  %s657_s19 = sshll.u32 %s41_s15, 7 }
  0x21   : > { %p1114_p2 = por %p204_p0, %p203_p11  ;;  %s632_s9 = sshll.u32 %s236_s12, 3 }
  0x22   : > { %s1121_s11 = scalar_lea.hbm %s1288_s0, %s657_s19  ;;  %s240_s14 = scalar_lea.vmem [#allocation3], %s632_s9 }
  0x23   : > { %s1306_s20 = scalar_select %p1114_p2, 1, 0 }
  0x24   : > { %s249_s18 = sshll.u32 %s240_s14, 4  ;;  %p1125_p3 = pnand %p699_p1, %p1081_p5  ;;  %s1129_s18 = int_to_ptr.vmem [resolvable:$true] %s249_s18 }
  0x25   : > { %s1131_s15 = scalar_lea.sflag [#allocation4], %s236_s12  ;;  %s814_s21 = scalar_lea.hbm %s1121_s11, 128 }
  0x26   : > { %p815_p4 = scmp.ne.s32.totalorder %s1121_s11, %s814_s21  ;;  %p816_p6 = pneg %p1125_p3 }
  0x27   : > { %s819_s19 = scalar_lea.hbm %s1288_s0, 768  ;;  %p820_p5 = scmp.lt.u32.totalorder %s1121_s11, %s1288_s0 }
  0x28   : > { %p817_p8 = pnand %p816_p6, %p815_p4  ;;  %p821_p10 = scmp.lt.u32.totalorder %s819_s19, %s814_s21 }
  0x29   : > { %p823_p12 = scmp.lt.u32.totalorder %s814_s21, %s1121_s11 }
  0x2a   : > { %p818_p9 = pneg %p817_p8  ;;  %p822_p11 = por %p821_p10, %p820_p5 }
  0x2c   : > { %p824_p0 = por %p823_p12, %p822_p11 }
  0x2e   : > { %p825_p1 = pnand %p824_p0, %p818_p9 }
  0x30   : > { %828 = shalt.err (!%p825_p1)
}
  0x31   : > { %s829_s12 = scalar_lea.vmem %s1129_s18, 128  ;;  %s968_s9 = smov [#allocation3]  }
  0x32   : > { %p830_p4 = scmp.ne.s32.totalorder %s1129_s18, %s829_s12  ;;  %s834_s16 = sshll.u32 %s968_s9, 4  ;;  %s835_s16 = int_to_ptr.vmem [resolvable:$false] %s834_s16 }
  0x33   : > { %s836_s22 = scalar_lea.vmem %s835_s16, 256  ;;  %p837_p13 = scmp.lt.s32.totalorder %s1129_s18, %s835_s16 }
  0x34   : > { %p832_p8 = pnand %p830_p4, %p816_p6  ;;  %p838_p5 = scmp.lt.s32.totalorder %s836_s22, %s829_s12 }
  0x36   : > { %p833_p2 = pneg %p832_p8  ;;  %p839_p10 = por %p838_p5, %p837_p13 }
  0x38   : > { %p840_p11 = pnand %p839_p10, %p833_p2 }
  0x3a   : > { %843 = shalt.err (!%p840_p11)
}
  0x3b   : > { %s969_s21 = smov 64   ;;  %s970_s19 = smov 4  }
  0x3c   : > { %694 = dma.hbm_to_vmem [thread:$0]  (!%p1125_p3), %s1121_s11, 128, %s1129_s18, %s1131_s15, %s969_s21, %s969_s21, %s970_s19  }
  0x3d   : > { %p635_p6 = scmp.ge.s32.totalorder %s966_s8, 1  ;;  %p270_p9 = scmp.lt.s32.totalorder %s966_s8, 7 }
  0x3f   : > { %p271_p12 = pnand %p635_p6, %p270_p9 }
  0x40   : > { %s276_s14 = sand.u32 (!%p271_p12), 1, %s942_s27  }
  0x41   : > { %274 = sbr.rel (%p271_p12) target bundleno = 667 (0x29b), region = 44  ;;  %s1162_s12 = sshll.u32 (!%p271_p12), %s276_s14, 3 }
  0x42   : > { %s277_s9 = scalar_lea.sflag (!%p271_p12), [#allocation4], %s276_s14 }
  0x48   : > { %917 = dma.done.wait (%p1087_p7), %s277_s9, 128  }
  0x49   : > { %919 = vsyncadd (%p1087_p7), %s277_s9, 4294967168  ;;  %s313_s11 = sand.u32 1, %s930_s24   ;;  %s318_s18 = smul.u32 3, %s954_s4 }
  0x4a   : > { %s1179_s16 = scalar_lea.vmem [#allocation6], %s313_s11  ;;  %p639_p7 = scmp.ne.s32.totalorder %s950_s29, 0 }
  0x4b   : > { %s319_s30 = sadd.s32 %s950_s29, %s318_s18  ;;  %v971_v1 = vmov (!%p639_p7), 0.0  }
  0x4c   : > { %s637_s15 = sshll.u32 %s319_s30, 1  ;;  %332 = sbr.rel (%p639_p7) target bundleno = 83 (0x53), region = 52  ;;  %333 = vst [vmem:[%s1179_s16] sm:$0x1] (!%p639_p7), %v971_v1 }
  0x4d   : > { %p321_p13 = scmp.lt.s32.totalorder %s637_s15, 11 }
  0x4f   : > { %s1329_s15 = smov (!%p321_p13, %s637_s15), 11 }
  0x50   : > { %s638_s22 = sshll.u32 %s1329_s15, 3 }
  0x51   : > { %s1175_s14 = scalar_lea.vmem %s1293_s5, %s638_s22 }
  0x53 PF: > { %v797_v2 = vld [vmem:[%s1289_s1] sm:$0xff]   ;;  %v972_v3 = vmov 0.0   ;;  %v798_v4 = vld [vmem:[%s1289_s1 + $0x8] sm:$0xff]   ;;  %vm973_vm0 = vmmov 0   ;;  %v799_v5 = vld [vmem:[%s1289_s1 + $0x10] sm:$0xff]   ;;  %s1308_s21 = scalar_lea.vmem [#allocation3], %s1162_s12  ;;  %v490_v41 = vlaneseq }
  0x54   : > { %667 = vmatprep.subr.bf16.mxu0 %v972_v3  ;;  %683 = vmatprep.mubr.msk.bf16.mxu0 %vm973_vm0, %v972_v3  ;;  %v800_v6 = vld [vmem:[%s1289_s1 + $0x18] sm:$0xff]   ;;  %v801_v7 = vld [vmem:[%s1289_s1 + $0x20] sm:$0xff]   ;;  %v802_v8 = vld [vmem:[%s1289_s1 + $0x28] sm:$0xff]   ;;  %v974_v13 = vmov 0   ;;  %s654_s9 = sshll.u32 %s954_s4, 4  ;;  %s537_s18 = sshll.u32 %s1179_s16, 4  ;;  %s1225_s18 = int_to_ptr.vmem [resolvable:$true] %s537_s18 }
  0x55   : > { %668 = vmatpush3.bf16.msra.mxu0 %v797_v2  ;;  %v803_v9 = vld [vmem:[%s1289_s1 + $0x30] sm:$0xff]   ;;  %v804_v10 = vld [vmem:[%s1289_s1 + $0x38] sm:$0xff]   ;;  %v492_v12 = vld [vmem:[%s1175_s14] sm:$0xff]  ;;  %795 = vset.pattern.permute.xlu1 %v974_v13  ;;  %v491_v42 = vand.u32 127, %v490_v41  ;;  %s1223_s15 = scalar_lea.hbm %s1294_s6, %s654_s9  ;;  %s525_s22 = scalar_lea.sflag [#allocation5], %s313_s11 }
  0x56   : > { %669 = vmatprep.subr.bf16.mxu0 %v972_v3  ;;  %v805_v11 = vld [vmem:[%s1308_s21] sm:$0xff]   ;;  %796 = vset.pattern.permute.xlu0 %v974_v13  ;;  %v640_v15 = vld [vmem:[%s1290_s2] ss:$0 sm:$0xff]  ;;  %s844_s21 = scalar_lea.vmem %s1225_s18, 16  ;;  %p1309_p3 = scmp.ne.s32.totalorder %s1304_s26, 0 }
  0x57   : > { %495 = vperm.xlu1 %795, %v492_v12   ;;  %v493_v14 = vld [vmem:[%s1175_s14 + $0x8] sm:$0xff]  ;;  %v652_v29 = vld [vmem:[%s1291_s3] ss:$0 sm:$0xff]  ;;  %p845_p2 = scmp.ne.s32.totalorder %s1225_s18, %s844_s21  ;;  %s975_s4 = smov [#allocation6]  }
  0x58   : > { %v653_v35 = vld [vmem:[#allocation2] ss:$0 sm:$0xff]  ;;  %s848_s19 = sshll.u32 %s975_s4, 4  ;;  %s849_s19 = int_to_ptr.vmem [resolvable:$false] %s848_s19 }
  0x59   : > { %670 = vmatpush3.bf16.msra.mxu0 %v798_v4  ;;  %v514_v54 = vld [vmem:[%s1179_s16] sm:$0x1]  ;;  %p846_p0 = pnand %p845_p2, %p1309_p3  ;;  %s850_s17 = scalar_lea.vmem %s849_s19, 32 }
  0x5a   : > { %671 = vmatprep.subr.bf16.mxu0 %v972_v3  ;;  %p851_p4 = scmp.lt.s32.totalorder %s1225_s18, %s849_s19  ;;  %p852_p8 = scmp.lt.s32.totalorder %s850_s17, %s844_s21 }
  0x5b   : > { %498 = vperm.xlu1 %795, %v493_v14   ;;  %p847_p1 = pneg %p846_p0 }
  0x5c   : > { %p853_p5 = por %p852_p8, %p851_p4 }
  0x5d   : > { %672 = vmatpush3.bf16.msra.mxu0 %v799_v5 }
  0x5e   : > { %673 = vmatprep.subr.bf16.mxu0 %v972_v3  ;;  %p854_p10 = pnand %p853_p5, %p847_p1 }
  0x61   : > { %674 = vmatpush3.bf16.msra.mxu0 %v800_v6 }
  0x62   : > { %675 = vmatprep.subr.bf16.mxu0 %v972_v3 }
  0x65   : > { %676 = vmatpush3.bf16.msra.mxu0 %v801_v7 }
  0x66   : > { %677 = vmatprep.subr.bf16.mxu0 %v972_v3 }
  0x69   : > { %678 = vmatpush3.bf16.msra.mxu0 %v802_v8 }
  0x6a   : > { %679 = vmatprep.subr.bf16.mxu0 %v972_v3 }
  0x6d   : > { %680 = vmatpush3.bf16.msra.mxu0 %v803_v9 }
  0x6e   : > { %681 = vmatprep.subr.bf16.mxu0 %v972_v3 }
  0x71   : > { %682 = vmatpush3.bf16.msra.mxu0 %v804_v10 }
  0x74   : > { %684 = vmatmul.mubr.bf16.vlgmr.msra.gmra.mrb[0].mxu0 %v805_v11 }
  0xd6   : > { %v496_v40 = vpop.permute.xlu1 %495 }
  0xd7   : > { %vm500_vm1 = vcmp.eq.s32.totalorder %v496_v40, %v491_v42 }
  0xda   : > { %v499_v43 = vpop.permute.xlu1 %498 }
  0xdb   : > { %vm501_vm2 = vcmp.eq.s32.totalorder %v499_v43, %v491_v42 }
 0x147   : > { %v447_v16 = vpop.f32.mrb[0].mxu0 }
 0x148   : > { %v448_v17 = vadd.f32 %v640_v15, %v447_v16  ;;  %v685_v18 = vpop.f32.mrb[1].mxu0 }
 0x149   : > { %v450_v19 = vpop.f32.mrb[2].mxu0 }
 0x14a   : > { %v650_v20 = vmul.f32 -1.442695, %v448_v17  ;;  %v451_v21 = vadd.f32 %v640_v15, %v450_v19  ;;  %v686_v22 = vpop.f32.mrb[3].mxu0 }
 0x14c   : > { %806 = vpow2.f32 %v650_v20  ;;  %v651_v23 = vmul.f32 -1.442695, %v451_v21 }
 0x14e   : > { %808 = vpow2.f32 %v651_v23 }
 0x156   : > { %v807_v24 = vpop.eup %806 }
 0x157   : > { %v460_v25 = vadd.f32 1.0, %v807_v24 }
 0x158   : > { %v809_v26 = vpop.eup %808 }
 0x159   : > { %810 = vrcp.f32 %v460_v25  ;;  %v461_v27 = vadd.f32 1.0, %v809_v26 }
 0x15b   : > { %812 = vrcp.f32 %v461_v27 }
 0x163   : > { %v811_v28 = vpop.eup %810 }
 0x164   : > { %v466_v30 = vmul.f32 %v811_v28, %v448_v17 }
 0x165   : > { %v813_v31 = vpop.eup %812 }
 0x166   : > { %v467_v32 = vmul.f32 %v813_v31, %v451_v21  ;;  %v475_v33 = vmul.f32 %v652_v29, %v466_v30 }
 0x168   : > { %477 = vadd.xlane.f32.xlu0 %v475_v33  ;;  %v476_v34 = vmul.f32 %v652_v29, %v467_v32 }
 0x16c   : > { %479 = vadd.xlane.f32.xlu0 %v476_v34 }
 0x1f5   : > { %v478_v36 = vpop.xlane.xlu0 %477 }
 0x1f6   : > { %v488_v37 = vadd.f32 %v653_v35, %v478_v36 }
 0x1f8   : > { %504 = vperm.xlu0 %796, %v488_v37  }
 0x1f9   : > { %v480_v38 = vpop.xlane.xlu0 %479 }
 0x1fa   : > { %v489_v39 = vadd.f32 %v653_v35, %v480_v38 }
 0x1fc   : > { %509 = vperm.xlu1 %795, %v489_v39  }
 0x277   : > { %v505_v44 = vpop.permute.xlu0 %504 }
 0x278   : > { %v512_v46 = vsel %vm500_vm1, %v505_v44, 0.0 }
 0x27b   : > { %v510_v45 = vpop.permute.xlu1 %509 }
 0x27c   : > { %v513_v47 = vsel %vm501_vm2, %v510_v45, 0.0 }
 0x27d   : > { %v515_v48 = vadd.f32 %v513_v47, %v512_v46 }
 0x27f   : > { %v516_v49 = vrot.slane %v515_v48, 4 }
 0x281   : > { %v517_v50 = vadd.f32 %v516_v49, %v515_v48 }
 0x283   : > { %v518_v51 = vrot.slane %v517_v50, 2 }
 0x285   : > { %v519_v52 = vadd.f32 %v518_v51, %v517_v50 }
 0x287   : > { %v520_v53 = vrot.slane %v519_v52, 1 }
 0x289   : > { %v521_v55 = vadd.f32 %v520_v53, %v519_v52 }
 0x28b   : > { %v522_v56 = vadd.f32 %v521_v55, %v514_v54 }
 0x28d   : > { %523 = vst [vmem:[%s1179_s16] sm:$0x1] %v522_v56 }
 0x28e   : > { %857 = shalt.err (!%p854_p10)
}
 0x28f   : > { %s858_s16 = scalar_lea.hbm %s1223_s15, 16  ;;  %s862_s14 = scalar_lea.hbm %s1294_s6, 32 }
 0x290   : > { %p859_p11 = scmp.ne.s32.totalorder %s1223_s15, %s858_s16  ;;  %p863_p12 = scmp.lt.u32.totalorder %s1223_s15, %s1294_s6 }
 0x291   : > { %p864_p13 = scmp.lt.u32.totalorder %s862_s14, %s858_s16  ;;  %p866_p2 = scmp.lt.u32.totalorder %s858_s16, %s1223_s15 }
 0x292   : > { %p860_p6 = pnand %p859_p11, %p1309_p3 }
 0x293   : > { %p865_p7 = por %p864_p13, %p863_p12 }
 0x294   : > { %p861_p9 = pneg %p860_p6 }
 0x295   : > { %p867_p0 = por %p866_p2, %p865_p7 }
 0x297   : > { %p868_p1 = pnand %p867_p0, %p861_p9 }
 0x299   : > { %871 = shalt.err (!%p868_p1)
}
 0x29a   : > { %689 = dma.vmem_to_hbm [thread:$0]  (%p1309_p3), %s1225_s18, 16, %s1223_s15, %s525_s22  }
 0x29b PF: > { %p700_p4 = scmp.ge.s32.totalorder %s966_s8, 2  ;;  %s549_s29 = sand.u32 1, %s926_s23  }
 0x29c   : > { %p1310_p8 = scmp.ne.s32.totalorder %s1306_s20, 0  ;;  %s550_s21 = scalar_lea.sflag [#allocation5], %s549_s29 }
 0x29e   : > { %p696_p5 = pnand %p700_p4, %p1310_p8 }
 0x2a0   : > { %921 = dma.done.wait (!%p696_p5), %s550_s21, 16  }
 0x2a1   : > { %923 = vsyncadd (!%p696_p5), %s550_s21, 4294967280  ;;  %s24_s8 = sadd.s32 1, %s966_s8   ;;  %s1311_s29 = sld [smem:[#allocation9_spill]] }
 0x2a2   : > { %p21_p10 = scmp.ge.s32.totalorder %s24_s8, 8   ;;  %s1312_s30 = sld [smem:[#allocation10_spill]] }
 0x2a3   : > { %s1313_s18 = sld [smem:[#allocation11_spill]]  ;;  %s1314_s23 = smov %s930_s24 }
 0x2a4   : > { %s1315_s24 = smov %s934_s25  ;;  %s1316_s25 = smov %s1105_s13 }
 0x2a5   : > { %s1317_s26 = smov %s942_s27  ;;  %s1318_s27 = smov %s946_s28 }
 0x2a6   : > { %s1319_s28 = smov %s1108_s10  ;;  %s1320_s4 = smov %s962_s7 }
 0x2a7   :  { %23 = sbr.rel (!%p21_p10) target bundleno = 12 (0xc), region = 96 }
 0x2a9   : > { %s1321_s7 = smov %s1313_s18 }
 0x2ae   :  { %554 = vsyncpa [#allocation4], 1 }
 0x2af   :  { %556 = vsyncpa [#allocation4 + $0x1], 1 }
 0x2b0   :  { %557 = vsyncpa [#allocation5], 1 }
 0x2b1   :  { %559 = vsyncpa [#allocation5 + $0x1], 1 }

</bundles_post_ra>
